<compile_context>
chip_gen: v7x
topology: tpu7x:2x2x1
jax: 0.10.0
libtpu: 0.0.40
codegen_flags: <defaults>
</compile_context>

<pallas_src>
import functools

import jax
import jax.numpy as jnp
from jax.experimental import pallas as pl
from jax.experimental.pallas import tpu as pltpu

EPS = 1e-5
LANE = 128


def _round_up(n, m):
    return ((n + m - 1) // m) * m


def _mlp_kernel(x_ref, w1_ref, w2_ref, w3_ref, vec_ref, o_ref, *, h1, h2):
    x = x_ref[...]                                  # (B, input_dim) f32
    inv_b = jnp.float32(1.0 / x.shape[0])

    # Packed per-feature params, rows = [g1, be1, g2, be2, b3_pad, 0, 0, 0],
    # padded to a full (8, >=128) lane tile.  Each payload starts at lane 0.
    v = vec_ref[...]
    g1, be1 = v[0:1, :h1], v[1:2, :h1]
    g2, be2 = v[2:3, :h2], v[3:4, :h2]

    def bn_relu(h, g, be):
        # One-pass stats: mu = E[h], var = E[h^2] - mu^2 (biased, train mode).
        s = jnp.sum(h, axis=0, keepdims=True)
        ss = jnp.sum(h * h, axis=0, keepdims=True)
        mu = s * inv_b
        var = jnp.maximum(ss * inv_b - mu * mu, 0.0)   # clamp f32 cancellation
        scale = g * jax.lax.rsqrt(var + EPS)           # rsqrt -> EUP slot
        shift = be - mu * scale
        return jnp.maximum(h * scale + shift, 0.0)     # single FMA pass + relu

    # bf16 MXU inputs, f32 accumulation; BN/ReLU stays f32 on the VPU.
    h = jnp.dot(x.astype(jnp.bfloat16), w1_ref[...],
                preferred_element_type=jnp.float32)
    h = bn_relu(h, g1, be1)
    # dropout -> identity
    h = jnp.dot(h.astype(jnp.bfloat16), w2_ref[...],
                preferred_element_type=jnp.float32)
    h = bn_relu(h, g2, be2)
    # dropout -> identity
    out = jnp.dot(h.astype(jnp.bfloat16), w3_ref[...],
                  preferred_element_type=jnp.float32)
    out = out + v[4:5, :out.shape[1]]                  # padded bias (zeros past out_dim)
    o_ref[...] = out.astype(o_ref.dtype)               # lane-dense (B, out_pad) store


def _pack_params(p):
    """One-time layout work: pack per-feature vectors into an (8, 128) slab,
    pad w3/b3 to 128 lanes, and pre-cast weights to bf16 for the MXU."""
    h1 = p["w1"].shape[1]
    h2 = p["w2"].shape[1]
    out_dim = p["w3"].shape[1]
    out_pad = _round_up(out_dim, LANE)
    lanes = max(_round_up(max(h1, h2), LANE), out_pad)

    def row(vrow):
        return jnp.pad(vrow, ((0, 0), (0, lanes - vrow.shape[1])))

    vec = jnp.concatenate(
        [row(p["g1"]), row(p["be1"]), row(p["g2"]), row(p["be2"]), row(p["b3"]),
         jnp.zeros((3, lanes), jnp.float32)], axis=0)          # (8, lanes)

    w3p = jnp.pad(p["w3"], ((0, 0), (0, out_pad - out_dim)))

    packed = dict(p)
    packed.update(
        vec=vec,
        w1_bf16=p["w1"].astype(jnp.bfloat16),
        w2_bf16=p["w2"].astype(jnp.bfloat16),
        w3p_bf16=w3p.astype(jnp.bfloat16),
        out_dim=out_dim,
        out_pad=out_pad,
    )
    return packed


def multiclass_classifier_forward(x, params):
    """x: (B, input_dim) float32.  params: output of init_params (pre-packed)."""
    B = x.shape[0]
    h1 = params["w1_bf16"].shape[1]
    h2 = params["w2_bf16"].shape[1]
    out_dim = params["out_dim"]
    out_pad = params["out_pad"]

    kernel = functools.partial(_mlp_kernel, h1=h1, h2=h2)

    # Tiny problem (~45 KB resident): single grid-less invocation, every
    # operand a full-extent VMEM block.  See header comment for the batch-grid
    # scale-up design (not used here to preserve whole-batch BN semantics).
    out_padded = pl.pallas_call(
        kernel,
        out_shape=jax.ShapeDtypeStruct((B, out_pad), jnp.float32),
        in_specs=[pl.BlockSpec(memory_space=pltpu.MemorySpace.VMEM)] * 5,
        out_specs=pl.BlockSpec(memory_space=pltpu.MemorySpace.VMEM),
    )(x, params["w1_bf16"], params["w2_bf16"], params["w3p_bf16"], params["vec"])

    # Downstream consumers doing argmax/softmax could keep the padded logits
    # (padding columns are exactly 0); slice once here to match module output.
    return out_padded[:, :out_dim]


def init_params(key, input_dim, hidden_layers, output_dim):
    h1, h2 = hidden_layers
    ks = jax.random.split(key, 6)

    def lin(kw, kb, fan_in, fan_out):
        bound = 1.0 / jnp.sqrt(fan_in)
        w = jax.random.uniform(kw, (fan_in, fan_out), jnp.float32, -bound, bound)
        b = jax.random.uniform(kb, (1, fan_out), jnp.float32, -bound, bound)
        return w, b

    w1, b1 = lin(ks[0], ks[1], input_dim, h1)
    w2, b2 = lin(ks[2], ks[3], h1, h2)
    w3, b3 = lin(ks[4], ks[5], h2, output_dim)
    raw = dict(
        w1=w1, b1=b1, g1=jnp.ones((1, h1), jnp.float32), be1=jnp.zeros((1, h1), jnp.float32),
        w2=w2, b2=b2, g2=jnp.ones((1, h2), jnp.float32), be2=jnp.zeros((1, h2), jnp.float32),
        w3=w3, b3=b3,
    )
    return _pack_params(raw)


def _reference_forward(x, p):
    """Pure-JAX f32 reference with the ORIGINAL PyTorch semantics (biases
    included, two-pass BN stats).  The kernel differs only by bf16 MXU inputs,
    the bias-cancellation rewrite and the one-pass variance."""
    def bn(h, g, be):
        mu = jnp.mean(h, axis=0, keepdims=True)
        var = jnp.mean((h - mu) ** 2, axis=0, keepdims=True)
        return (h - mu) / jnp.sqrt(var + EPS) * g + be

    h = x @ p["w1"] + p["b1"]
    h = jnp.maximum(bn(h, p["g1"], p["be1"]), 0.0)
    h = h @ p["w2"] + p["b2"]
    h = jnp.maximum(bn(h, p["g2"], p["be2"]), 0.0)
    return h @ p["w3"] + p["b3"]


if __name__ == "__main__":
    key = jax.random.PRNGKey(0)
    k_x, k_p = jax.random.split(key)

    # B=128 amortizes fixed per-call overhead and fills MXU rows.
    batch, input_dim, hidden_layers, output_dim = 128, 32, (64, 48), 10
    x = jax.random.normal(k_x, (batch, input_dim), jnp.float32)
    params = init_params(k_p, input_dim, hidden_layers, output_dim)

    out = multiclass_classifier_forward(x, params)
    out = jax.block_until_ready(out)

    ref = _reference_forward(x, params)
    assert out.shape == (batch, output_dim)
    # Tolerance accounts for bf16 MXU inputs (~2^-8 relative) amplified through
    # two BatchNorm normalizations; BN/bias algebra itself is exact in f32.
    max_diff = float(jnp.max(jnp.abs(out - ref)))
    assert jnp.allclose(out, ref, atol=5e-2, rtol=5e-2), (
        "mismatch vs reference, max abs diff = %e" % max_diff)
    print("KERNEL_OK")
</pallas_src>

<mosaic_0001>
module attributes {stable_mosaic.version = 11 : i64} {
  func.func @_mlp_kernel(%arg0: memref<128x32xf32, #tpu.memory_space<vmem>>, %arg1: memref<32x64xbf16, #tpu.memory_space<vmem>>, %arg2: memref<64x48xbf16, #tpu.memory_space<vmem>>, %arg3: memref<48x128xbf16, #tpu.memory_space<vmem>>, %arg4: memref<8x128xf32, #tpu.memory_space<vmem>>, %arg5: memref<128x128xf32, #tpu.memory_space<vmem>>) attributes {dimension_semantics = [], scalar_prefetch = 0 : i64, scratch_operands = 0 : i64, tpu.core_type = #tpu.core_type<tc>} {
    %c0 = arith.constant 0 : index
    %c0_0 = arith.constant 0 : index
    %0 = vector.load %arg0[%c0, %c0_0] : memref<128x32xf32, #tpu.memory_space<vmem>>, vector<128x32xf32>
    %c0_1 = arith.constant 0 : index
    %c0_2 = arith.constant 0 : index
    %1 = vector.load %arg4[%c0_1, %c0_2] : memref<8x128xf32, #tpu.memory_space<vmem>>, vector<8x128xf32>
    %2 = vector.extract_strided_slice %1 {offsets = [0, 0], sizes = [1, 64], strides = [1, 1]} : vector<8x128xf32> to vector<1x64xf32>
    %3 = vector.extract_strided_slice %1 {offsets = [1, 0], sizes = [1, 64], strides = [1, 1]} : vector<8x128xf32> to vector<1x64xf32>
    %4 = vector.extract_strided_slice %1 {offsets = [2, 0], sizes = [1, 48], strides = [1, 1]} : vector<8x128xf32> to vector<1x48xf32>
    %5 = vector.extract_strided_slice %1 {offsets = [3, 0], sizes = [1, 48], strides = [1, 1]} : vector<8x128xf32> to vector<1x48xf32>
    %6 = arith.truncf %0 : vector<128x32xf32> to vector<128x32xbf16>
    %c0_3 = arith.constant 0 : index
    %c0_4 = arith.constant 0 : index
    %7 = vector.load %arg1[%c0_3, %c0_4] : memref<32x64xbf16, #tpu.memory_space<vmem>>, vector<32x64xbf16>
    %cst = arith.constant dense<0.000000e+00> : vector<128x64xf32>
    %8 = tpu.matmul %6, %7, %cst {dimension_numbers = #tpu.dot_dimension_numbers<[1], [0], [0], [1], [0, 0, 1, 1], [], []>} : vector<128x32xbf16>, vector<32x64xbf16>, vector<128x64xf32> -> vector<128x64xf32>
    %cst_5 = arith.constant dense<0.000000e+00> : vector<64xf32>
    %9 = vector.multi_reduction <add>, %8, %cst_5 [0] : vector<128x64xf32> to vector<64xf32>
    %10 = vector.shape_cast %9 : vector<64xf32> to vector<1x64xf32>
    %11 = arith.mulf %8, %8 : vector<128x64xf32>
    %cst_6 = arith.constant dense<0.000000e+00> : vector<64xf32>
    %12 = vector.multi_reduction <add>, %11, %cst_6 [0] : vector<128x64xf32> to vector<64xf32>
    %13 = vector.shape_cast %12 : vector<64xf32> to vector<1x64xf32>
    %cst_7 = arith.constant 7.812500e-03 : f32
    %14 = vector.broadcast %cst_7 : f32 to vector<1x64xf32>
    %15 = arith.mulf %10, %14 : vector<1x64xf32>
    %cst_8 = arith.constant 7.812500e-03 : f32
    %16 = vector.broadcast %cst_8 : f32 to vector<1x64xf32>
    %17 = arith.mulf %13, %16 : vector<1x64xf32>
    %18 = arith.mulf %15, %15 : vector<1x64xf32>
    %19 = arith.subf %17, %18 : vector<1x64xf32>
    %cst_9 = arith.constant 0.000000e+00 : f32
    %20 = vector.broadcast %cst_9 : f32 to vector<1x64xf32>
    %21 = arith.maximumf %19, %20 : vector<1x64xf32>
    %cst_10 = arith.constant 9.99999974E-6 : f32
    %22 = vector.broadcast %cst_10 : f32 to vector<1x64xf32>
    %23 = arith.addf %21, %22 : vector<1x64xf32>
    %24 = math.rsqrt %23 : vector<1x64xf32>
    %25 = arith.mulf %2, %24 : vector<1x64xf32>
    %26 = arith.mulf %15, %25 : vector<1x64xf32>
    %27 = arith.subf %3, %26 : vector<1x64xf32>
    %28 = vector.broadcast %25 : vector<1x64xf32> to vector<128x64xf32>
    %29 = arith.mulf %8, %28 : vector<128x64xf32>
    %30 = vector.broadcast %27 : vector<1x64xf32> to vector<128x64xf32>
    %31 = arith.addf %29, %30 : vector<128x64xf32>
    %cst_11 = arith.constant 0.000000e+00 : f32
    %32 = vector.broadcast %cst_11 : f32 to vector<128x64xf32>
    %33 = arith.maximumf %31, %32 : vector<128x64xf32>
    %34 = arith.truncf %33 : vector<128x64xf32> to vector<128x64xbf16>
    %c0_12 = arith.constant 0 : index
    %c0_13 = arith.constant 0 : index
    %35 = vector.load %arg2[%c0_12, %c0_13] : memref<64x48xbf16, #tpu.memory_space<vmem>>, vector<64x48xbf16>
    %cst_14 = arith.constant dense<0.000000e+00> : vector<128x48xf32>
    %36 = tpu.matmul %34, %35, %cst_14 {dimension_numbers = #tpu.dot_dimension_numbers<[1], [0], [0], [1], [0, 0, 1, 1], [], []>} : vector<128x64xbf16>, vector<64x48xbf16>, vector<128x48xf32> -> vector<128x48xf32>
    %cst_15 = arith.constant dense<0.000000e+00> : vector<48xf32>
    %37 = vector.multi_reduction <add>, %36, %cst_15 [0] : vector<128x48xf32> to vector<48xf32>
    %38 = vector.shape_cast %37 : vector<48xf32> to vector<1x48xf32>
    %39 = arith.mulf %36, %36 : vector<128x48xf32>
    %cst_16 = arith.constant dense<0.000000e+00> : vector<48xf32>
    %40 = vector.multi_reduction <add>, %39, %cst_16 [0] : vector<128x48xf32> to vector<48xf32>
    %41 = vector.shape_cast %40 : vector<48xf32> to vector<1x48xf32>
    %cst_17 = arith.constant 7.812500e-03 : f32
    %42 = vector.broadcast %cst_17 : f32 to vector<1x48xf32>
    %43 = arith.mulf %38, %42 : vector<1x48xf32>
    %cst_18 = arith.constant 7.812500e-03 : f32
    %44 = vector.broadcast %cst_18 : f32 to vector<1x48xf32>
    %45 = arith.mulf %41, %44 : vector<1x48xf32>
    %46 = arith.mulf %43, %43 : vector<1x48xf32>
    %47 = arith.subf %45, %46 : vector<1x48xf32>
    %cst_19 = arith.constant 0.000000e+00 : f32
    %48 = vector.broadcast %cst_19 : f32 to vector<1x48xf32>
    %49 = arith.maximumf %47, %48 : vector<1x48xf32>
    %cst_20 = arith.constant 9.99999974E-6 : f32
    %50 = vector.broadcast %cst_20 : f32 to vector<1x48xf32>
    %51 = arith.addf %49, %50 : vector<1x48xf32>
    %52 = math.rsqrt %51 : vector<1x48xf32>
    %53 = arith.mulf %4, %52 : vector<1x48xf32>
    %54 = arith.mulf %43, %53 : vector<1x48xf32>
    %55 = arith.subf %5, %54 : vector<1x48xf32>
    %56 = vector.broadcast %53 : vector<1x48xf32> to vector<128x48xf32>
    %57 = arith.mulf %36, %56 : vector<128x48xf32>
    %58 = vector.broadcast %55 : vector<1x48xf32> to vector<128x48xf32>
    %59 = arith.addf %57, %58 : vector<128x48xf32>
    %cst_21 = arith.constant 0.000000e+00 : f32
    %60 = vector.broadcast %cst_21 : f32 to vector<128x48xf32>
    %61 = arith.maximumf %59, %60 : vector<128x48xf32>
    %62 = arith.truncf %61 : vector<128x48xf32> to vector<128x48xbf16>
    %c0_22 = arith.constant 0 : index
    %c0_23 = arith.constant 0 : index
    %63 = vector.load %arg3[%c0_22, %c0_23] : memref<48x128xbf16, #tpu.memory_space<vmem>>, vector<48x128xbf16>
    %cst_24 = arith.constant dense<0.000000e+00> : vector<128x128xf32>
    %64 = tpu.matmul %62, %63, %cst_24 {dimension_numbers = #tpu.dot_dimension_numbers<[1], [0], [0], [1], [0, 0, 1, 1], [], []>} : vector<128x48xbf16>, vector<48x128xbf16>, vector<128x128xf32> -> vector<128x128xf32>
    %65 = vector.extract_strided_slice %1 {offsets = [4, 0], sizes = [1, 128], strides = [1, 1]} : vector<8x128xf32> to vector<1x128xf32>
    %66 = vector.broadcast %65 : vector<1x128xf32> to vector<128x128xf32>
    %67 = arith.addf %64, %66 : vector<128x128xf32>
    %c0_25 = arith.constant 0 : index
    %c0_26 = arith.constant 0 : index
    %68 = vector.load %arg5[%c0_25, %c0_26] : memref<128x128xf32, #tpu.memory_space<vmem>>, vector<128x128xf32>
    tpu.vector_store %arg5[%c0_25, %c0_26], %67 {strides = array<i32>} : memref<128x128xf32, #tpu.memory_space<vmem>>, vector<128x128xf32>,
    return
  }
}

</mosaic_0001>

<bundles_post_ra>
// kernel: tpu_custom_call.1
= control target key start
LH: loop header
LB: loop body
LE: loop exit
PB: predicated region body
PF: predicated region fallthrough
CT: control target
= control target key end

     0   :  { %vm63_vm0 = vcmask 261120   ;;  %s1436_s0 = inlined_call_operand.vmem [shape: f32[128,32], index: 0, kind: input, shape index: {}]   ;;  %s1437_s1 = inlined_call_operand.vmem [shape: bf16[32,64], index: 1, kind: input, shape index: {}]   ;;  %s1438_s2 = inlined_call_operand.vmem [shape: bf16[64,48], index: 2, kind: input, shape index: {}]   ;;  %s1439_s3 = inlined_call_operand.vmem [shape: bf16[48,128], index: 3, kind: input, shape index: {}]   ;;  %s1440_s4 = inlined_call_operand.vmem [shape: f32[8,128], index: 4, kind: input, shape index: {}]   ;;  %s1441_s5 = inlined_call_operand.hbm [shape: f32[128,128], index: 5, kind: output, shape index: {}]  }
   0x1   :  { %v994_v0 = vld [vmem:[%s1437_s1] sm:$0xff]   ;;  %v995_v1 = vld [vmem:[%s1437_s1 + $0x8] sm:$0xff]   ;;  %v24_v5 = vld [vmem:[%s1436_s0 + $0x10] sm:$0xff] }
   0x2   :  { %921 = vmatprep.subr.bf16.mxu0 %v994_v0  ;;  %v22_v2 = vld [vmem:[%s1436_s0] sm:$0xff]  ;;  %v23_v3 = vld [vmem:[%s1436_s0 + $0x8] sm:$0xff]  ;;  %987 = vmatprep.subr.bf16.mxu1 %v994_v0  ;;  %v25_v6 = vld [vmem:[%s1436_s0 + $0x18] sm:$0xff] }
   0x3   :  { %922 = vmatpush3.bf16.msra.mxu0 %v994_v0  ;;  %v39_v4 = vpack.c.bf16 %v23_v3, %v22_v2  ;;  %989 = vmatpush3.bf16.msra.mxu1 %v994_v0  ;;  %v26_v7 = vld [vmem:[%s1436_s0 + $0x20] sm:$0xff]  ;;  %v27_v8 = vld [vmem:[%s1436_s0 + $0x28] sm:$0xff]  ;;  %v32_v11 = vld [vmem:[%s1436_s0 + $0x50] sm:$0xff]  ;;  %v40_v13 = vpack.c.bf16 %v25_v6, %v24_v5 }
   0x4   :  { %923 = vmatprep.subr.bf16.mxu0 %v995_v1  ;;  %988 = vmatprep.subr.bf16.mxu1 %v995_v1  ;;  %v30_v9 = vld [vmem:[%s1436_s0 + $0x40] sm:$0xff]  ;;  %v31_v10 = vld [vmem:[%s1436_s0 + $0x48] sm:$0xff]  ;;  %v33_v12 = vld [vmem:[%s1436_s0 + $0x58] sm:$0xff]  ;;  %v41_v18 = vpack.c.bf16 %v27_v8, %v26_v7 }
   0x5   :  { %925 = vmatprep.mubr.msk.bf16.mxu0 %vm63_vm0, %v39_v4  ;;  %v43_v14 = vpack.c.bf16 %v31_v10, %v30_v9  ;;  %v44_v15 = vpack.c.bf16 %v33_v12, %v32_v11  ;;  %v34_v16 = vld [vmem:[%s1436_s0 + $0x60] sm:$0xff]  ;;  %v35_v17 = vld [vmem:[%s1436_s0 + $0x68] sm:$0xff]  ;;  %v28_v20 = vld [vmem:[%s1436_s0 + $0x30] sm:$0xff] }
   0x6   :  { %v45_v19 = vpack.c.bf16 %v35_v17, %v34_v16  ;;  %v29_v21 = vld [vmem:[%s1436_s0 + $0x38] sm:$0xff]  ;;  %v36_v22 = vld [vmem:[%s1436_s0 + $0x70] sm:$0xff] }
   0x7   :  { %924 = vmatpush3.bf16.msra.mxu0 %v995_v1  ;;  %990 = vmatpush3.bf16.msra.mxu1 %v995_v1  ;;  %v37_v23 = vld [vmem:[%s1436_s0 + $0x78] sm:$0xff] }
   0x8   :  { %933 = vmatprep.mubr.msk.bf16.mxu1 %vm63_vm0, %v43_v14 }
   0xa   :  { %926 = vmatmul.mubr.msk.bf16.vlgmr.msra.gmra.mrb[0].mxu0 %vm63_vm0, %v40_v13  ;;  %934 = vmatmul.mubr.msk.bf16.vlgmr.msra.gmra.mrb[0].mxu1 %vm63_vm0, %v44_v15 }
   0xb   :  { %929 = vmatprep.mubr.msk.bf16.mxu0 %vm63_vm0, %v41_v18  ;;  %937 = vmatprep.mubr.msk.bf16.mxu1 %vm63_vm0, %v45_v19 }
   0xc   :  { %10 = vsyncpa [#allocation3], 0  ;;  %v42_v24 = vpack.c.bf16 %v29_v21, %v28_v20  ;;  %v46_v25 = vpack.c.bf16 %v37_v23, %v36_v22  ;;  %v996_v26 = vld [vmem:[%s1438_s2] sm:$0xff]   ;;  %v997_v27 = vld [vmem:[%s1438_s2 + $0x8] sm:$0xff]   ;;  %vm185_vm1 = vcmask 523264   ;;  %vm506_vm2 = vcmask 392192  }
   0xd   :  { %941 = vmatprep.subr.bf16.mxu1 %v996_v26  ;;  %v998_v28 = vld [vmem:[%s1438_s2 + $0x10] sm:$0xff]   ;;  %v999_v29 = vld [vmem:[%s1438_s2 + $0x18] sm:$0xff]  }
   0xe   :  { %942 = vmatpush3.bf16.msra.mxu1 %v996_v26 }
   0xf   :  { %943 = vmatprep.subr.bf16.mxu1 %v997_v27 }
  0x12   :  { %930 = vmatmul.mubr.msk.bf16.gmra.mrb[4].mxu0 %vm63_vm0, %v42_v24  ;;  %938 = vmatmul.mubr.msk.bf16.gmra.mrb[4].mxu1 %vm63_vm0, %v46_v25 }
  0x13   :  { %944 = vmatpush3.bf16.msra.mxu1 %v997_v27 }
  0x14   :  { %945 = vmatprep.subr.bf16.mxu1 %v998_v28 }
  0x17   :  { %946 = vmatpush3.bf16.msra.mxu1 %v998_v28 }
  0x18   :  { %947 = vmatprep.subr.bf16.mxu1 %v999_v29 }
  0x1b   :  { %948 = vmatpush3.bf16.msra.mxu1 %v999_v29 }
  0xdd   :  { %v1138_v30 = vpop.f32.mrb[0].mxu0  ;;  %v1140_v31 = vpop.f32.mrb[0].mxu1 }
  0xde   :  { %v1142_v32 = vpop.f32.mrb[1].mxu0  ;;  %v1144_v33 = vpop.f32.mrb[1].mxu1  ;;  %v225_v39 = vmul.f32 %v1138_v30, %v1138_v30  ;;  %v189_v44 = vsel %vm185_vm1, %v1138_v30, 0.0  ;;  %v233_v25 = vmul.f32 %v1140_v31, %v1140_v31  ;;  %v205_v29 = vsel %vm185_vm1, %v1140_v31, 0.0 }
  0xdf   :  { %v223_v34 = vmul.f32 %v1142_v32, %v1142_v32  ;;  %v1148_v35 = vpop.f32.mrb[2].mxu0  ;;  %v1150_v36 = vpop.f32.mrb[2].mxu1  ;;  %v186_v40 = vsel %vm185_vm1, %v1142_v32, 0.0  ;;  %v231_v12 = vmul.f32 %v1144_v33, %v1144_v33  ;;  %v201_v17 = vsel %vm185_vm1, %v1144_v33, 0.0 }
  0xe0   :  { %v1152_v37 = vpop.f32.mrb[3].mxu0  ;;  %v1154_v38 = vpop.f32.mrb[3].mxu1  ;;  %v226_v46 = vmul.f32 %v1148_v35, %v1148_v35  ;;  %v242_v50 = vsel %vm185_vm1, %v225_v39, 0.0  ;;  %v191_v51 = vsel %vm185_vm1, %v1148_v35, 0.0 }
  0xe1   :  { %v187_v41 = vsel %vm185_vm1, %v1152_v37, 0.0  ;;  %v224_v42 = vmul.f32 %v1152_v37, %v1152_v37  ;;  %v239_v45 = vsel %vm185_vm1, %v223_v34, 0.0  ;;  %v254_v21 = vsel %vm185_vm1, %v231_v12, 0.0 }
  0xe2   :  { %v188_v43 = vadd.f32 %v187_v41, %v186_v40  ;;  %v244_v58 = vsel %vm185_vm1, %v226_v46, 0.0  ;;  %v232_v22 = vmul.f32 %v1154_v38, %v1154_v38  ;;  %v203_v26 = vsel %vm185_vm1, %v1154_v38, 0.0 }
  0xe3   :  { %v240_v47 = vsel %vm185_vm1, %v224_v42, 0.0  ;;  %v234_v34 = vmul.f32 %v1150_v36, %v1150_v36 }
  0xe4   :  { %v190_v48 = vadd.f32 %v189_v44, %v188_v43  ;;  %v241_v49 = vadd.f32 %v240_v47, %v239_v45  ;;  %v256_v39 = vsel %vm185_vm1, %v232_v22, 0.0  ;;  %v258_v43 = vsel %vm185_vm1, %v233_v25, 0.0 }
  0xe5   :  { %v1173_v52 = vpop.f32.mrb[4].mxu0  ;;  %v1175_v53 = vpop.f32.mrb[4].mxu1  ;;  %v207_v44 = vsel %vm185_vm1, %v1150_v36, 0.0 }
  0xe6   :  { %v243_v54 = vadd.f32 %v242_v50, %v241_v49  ;;  %v1177_v55 = vpop.f32.mrb[5].mxu0  ;;  %v192_v56 = vadd.f32 %v191_v51, %v190_v48  ;;  %v1179_v57 = vpop.f32.mrb[5].mxu1  ;;  %v229_v3 = vmul.f32 %v1173_v52, %v1173_v52  ;;  %v197_v9 = vsel %vm185_vm1, %v1173_v52, 0.0 }
  0xe7   :  { %v193_v59 = vsel %vm185_vm1, %v1177_v55, 0.0  ;;  %v227_v60 = vmul.f32 %v1177_v55, %v1177_v55  ;;  %v1186_v61 = vpop.f32.mrb[6].mxu0  ;;  %v1188_v62 = vpop.f32.mrb[6].mxu1  ;;  %v235_v40 = vmul.f32 %v1179_v57, %v1179_v57  ;;  %v209_v45 = vsel %vm185_vm1, %v1179_v57, 0.0 }
  0xe8   :  { %v194_v63 = vadd.f32 %v193_v59, %v192_v56  ;;  %v245_v0 = vadd.f32 %v244_v58, %v243_v54  ;;  %v1190_v1 = vpop.f32.mrb[7].mxu0  ;;  %v1192_v2 = vpop.f32.mrb[7].mxu1  ;;  %v230_v10 = vmul.f32 %v1186_v61, %v1186_v61  ;;  %v250_v15 = vsel %vm185_vm1, %v229_v3, 0.0 }
  0xe9   :  { %v246_v4 = vsel %vm185_vm1, %v227_v60, 0.0  ;;  %v195_v5 = vsel %vm185_vm1, %v1190_v1, 0.0  ;;  %v228_v6 = vmul.f32 %v1190_v1, %v1190_v1  ;;  %v199_v16 = vsel %vm185_vm1, %v1186_v61, 0.0 }
  0xea   :  { %v247_v7 = vadd.f32 %v246_v4, %v245_v0  ;;  %v196_v8 = vadd.f32 %v195_v5, %v194_v63  ;;  %v252_v20 = vsel %vm185_vm1, %v230_v10, 0.0  ;;  %v260_v48 = vsel %vm185_vm1, %v234_v34, 0.0 }
  0xeb   :  { %v248_v11 = vsel %vm185_vm1, %v228_v6, 0.0  ;;  %v262_v49 = vsel %vm185_vm1, %v235_v40, 0.0  ;;  %v236_v50 = vmul.f32 %v1192_v2, %v1192_v2  ;;  %v237_v56 = vmul.f32 %v1175_v53, %v1175_v53  ;;  %v1255_v40 = vld [vmem:[%s1440_s4] sm:$0xff] }
  0xec   :  { %v198_v13 = vadd.f32 %v197_v9, %v196_v8  ;;  %v249_v14 = vadd.f32 %v248_v11, %v247_v7  ;;  %v211_v58 = vsel %vm185_vm1, %v1192_v2, 0.0  ;;  %v213_v63 = vsel %vm185_vm1, %v1175_v53, 0.0 }
  0xed   :  { %v238_v0 = vmul.f32 %v1188_v62, %v1188_v62  ;;  %v264_v3 = vsel %vm185_vm1, %v236_v50, 0.0  ;;  %v266_v6 = vsel %vm185_vm1, %v237_v56, 0.0  ;;  %v215_v7 = vsel %vm185_vm1, %v1188_v62, 0.0 }
  0xee   :  { %v251_v18 = vadd.f32 %v250_v15, %v249_v14  ;;  %v200_v19 = vadd.f32 %v199_v16, %v198_v13  ;;  %v289_v34 = vlaneseq }
  0xef   :  { %v268_v10 = vsel %vm185_vm1, %v238_v0, 0.0 }
  0xf0   :  { %v202_v23 = vadd.f32 %v201_v17, %v200_v19  ;;  %v253_v24 = vadd.f32 %v252_v20, %v251_v18 }
  0xf2   :  { %v255_v27 = vadd.f32 %v254_v21, %v253_v24  ;;  %v204_v28 = vadd.f32 %v203_v26, %v202_v23 }
  0xf4   :  { %v206_v41 = vadd.f32 %v205_v29, %v204_v28  ;;  %v257_v42 = vadd.f32 %v256_v39, %v255_v27  ;;  %v1250_v39 = vshrl.u32 %v289_v34, 7 }
  0xf6   :  { %v259_v46 = vadd.f32 %v258_v43, %v257_v42  ;;  %v208_v47 = vadd.f32 %v207_v44, %v206_v41  ;;  %v291_v41 = vsub.s32 0, %v1250_v39 }
  0xf8   :  { %v210_v51 = vadd.f32 %v209_v45, %v208_v47  ;;  %v261_v54 = vadd.f32 %v260_v48, %v259_v46  ;;  %v311_v46 = vsub.s32 1, %v1250_v39 }
  0xfa   :  { %v263_v59 = vadd.f32 %v262_v49, %v261_v54  ;;  %v212_v60 = vadd.f32 %v211_v58, %v210_v51 }
  0xfc   :  { %v214_v4 = vadd.f32 %v213_v63, %v212_v60  ;;  %v265_v5 = vadd.f32 %v264_v3, %v263_v59 }
  0xfe   :  { %v216_v8 = vadd.f32 %v215_v7, %v214_v4  ;;  %v267_v9 = vadd.f32 %v266_v6, %v265_v5 }
 0x100   :  { %v217_v11 = vrot.slane %v216_v8, 4  ;;  %v269_v12 = vadd.f32 %v268_v10, %v267_v9 }
 0x102   :  { %v218_v13 = vadd.f32 %v217_v11, %v216_v8  ;;  %v270_v14 = vrot.slane %v269_v12, 4 }
 0x104   :  { %v219_v15 = vrot.slane %v218_v13, 2  ;;  %v271_v16 = vadd.f32 %v270_v14, %v269_v12 }
 0x106   :  { %v220_v17 = vadd.f32 %v219_v15, %v218_v13  ;;  %v272_v18 = vrot.slane %v271_v16, 2 }
 0x108   :  { %v221_v19 = vrot.slane %v220_v17, 1  ;;  %v273_v20 = vadd.f32 %v272_v18, %v271_v16 }
 0x10a   :  { %v222_v21 = vadd.f32 %v221_v19, %v220_v17  ;;  %v274_v22 = vrot.slane %v273_v20, 1 }
 0x10c   :  { %v275_v23 = vadd.f32 %v274_v22, %v273_v20  ;;  %v276_v24 = vmul.f32 0.0078125, %v222_v21 }
 0x10e   :  { %v277_v25 = vmul.f32 0.0078125, %v275_v23  ;;  %v278_v26 = vmul.f32 %v276_v24, %v276_v24 }
 0x110   :  { %v279_v27 = vsub.f32 %v277_v25, %v278_v26 }
 0x112   :  { %v280_v28 = vmax.f32 %v279_v27, 0.0 }
 0x114   :  { %v281_v29 = vadd.f32 1e-05, %v280_v28 }
 0x116   :  { %1003 = vrsqrt.f32 %v281_v29 }
 0x120   :  { %v1004_v42 = vpop.eup %1003 }
 0x121   :  { %v283_v43 = vmul.f32 %v1004_v42, %v1255_v40 }
 0x123   :  { %v284_v44 = vmul.f32 %v283_v43, %v276_v24  ;;  %v292_v45 = vrot.slane %v283_v43, %v291_v41 }
 0x125   :  { %v286_v47 = vrot.slane %v284_v44, 7  ;;  %v306_v48 = vmul.f32 %v292_v45, %v1192_v2  ;;  %v293_v49 = vmul.f32 %v292_v45, %v1142_v32  ;;  %v294_v50 = vmul.f32 %v292_v45, %v1152_v37  ;;  %v1000_v44 = vld [vmem:[%s1439_s3] sm:$0xff]  }
 0x126   :  { %v295_v51 = vmul.f32 %v1138_v30, %v292_v45  ;;  %v296_v54 = vmul.f32 %v1148_v35, %v292_v45  ;;  %v297_v56 = vmul.f32 %v292_v45, %v1177_v55  ;;  %v298_v58 = vmul.f32 %v292_v45, %v1190_v1  ;;  %965 = vmatprep.subr.bf16.mxu0 %v1000_v44 }
 0x127   :  { %v288_v59 = vsub.f32 %v1255_v40, %v286_v47  ;;  %v299_v60 = vmul.f32 %v1173_v52, %v292_v45  ;;  %v300_v63 = vmul.f32 %v1186_v61, %v292_v45  ;;  %v301_v2 = vmul.f32 %v292_v45, %v1144_v33  ;;  %966 = vmatpush3.bf16.msra.mxu0 %v1000_v44 }
 0x128   :  { %v302_v32 = vmul.f32 %v292_v45, %v1154_v38  ;;  %v303_v37 = vmul.f32 %v1140_v31, %v292_v45  ;;  %v304_v30 = vmul.f32 %v1150_v36, %v292_v45  ;;  %v305_v35 = vmul.f32 %v292_v45, %v1179_v57 }
 0x129   :  { %v312_v0 = vrot.slane %v288_v59, %v311_v46  ;;  %v307_v55 = vmul.f32 %v1175_v53, %v292_v45  ;;  %v308_v1 = vmul.f32 %v1188_v62, %v292_v45  ;;  %v1001_v45 = vld [vmem:[%s1439_s3 + $0x8] sm:$0xff]   ;;  %v1002_v46 = vld [vmem:[%s1439_s3 + $0x10] sm:$0xff]   ;;  %s1031_s3 = smov [#allocation2]  }
 0x12a   :  { %967 = vmatprep.subr.bf16.mxu0 %v1001_v45  ;;  %s844_s15 = sshll.u32 %s1031_s3, 4  ;;  %s845_s15 = int_to_ptr.vmem [resolvable:$true] %s844_s15 }
 0x12b   :  { %v326_v3 = vadd.f32 %v312_v0, %v306_v48  ;;  %v313_v4 = vadd.f32 %v312_v0, %v293_v49  ;;  %v314_v52 = vadd.f32 %v312_v0, %v294_v50  ;;  %v315_v5 = vadd.f32 %v312_v0, %v295_v51  ;;  %968 = vmatpush3.bf16.msra.mxu0 %v1001_v45  ;;  %s1007_s16 = scalar_lea.vmem %s845_s15, 2048  ;;  %p1012_p1 = scmp.lt.s32.totalorder %s845_s15, %s845_s15 }
 0x12c   :  { %v316_v61 = vadd.f32 %v312_v0, %v296_v54  ;;  %v317_v6 = vadd.f32 %v312_v0, %v297_v56  ;;  %v318_v33 = vadd.f32 %v312_v0, %v298_v58  ;;  %v319_v7 = vadd.f32 %v312_v0, %v299_v60  ;;  %969 = vmatprep.subr.bf16.mxu0 %v1002_v46  ;;  %p1008_p0 = scmp.ne.s32.totalorder %s845_s15, %s1007_s16  ;;  %p1013_p2 = scmp.lt.s32.totalorder %s1007_s16, %s1007_s16 }
 0x12d   :  { %v342_v38 = vmax.f32 %v326_v3, 0.0  ;;  %v329_v8 = vmax.f32 %v313_v4, 0.0  ;;  %v330_v31 = vmax.f32 %v314_v52, 0.0  ;;  %v331_v9 = vmax.f32 %v315_v5, 0.0 }
 0x12e   :  { %v332_v36 = vmax.f32 %v316_v61, 0.0  ;;  %v333_v10 = vmax.f32 %v317_v6, 0.0  ;;  %v334_v57 = vmax.f32 %v318_v33, 0.0  ;;  %v320_v11 = vadd.f32 %v312_v0, %v300_v63  ;;  %p1014_p3 = por %p1013_p2, %p1012_p1 }
 0x12f   :  { %v345_v12 = vpack.c.bf16 %v330_v31, %v329_v8  ;;  %v335_v53 = vmax.f32 %v319_v7, 0.0  ;;  %v321_v13 = vadd.f32 %v312_v0, %v301_v2  ;;  %v322_v62 = vadd.f32 %v312_v0, %v302_v32  ;;  %970 = vmatpush3.bf16.msra.mxu0 %v1002_v46 }
 0x130   :  { %v346_v14 = vpack.c.bf16 %v332_v36, %v331_v9  ;;  %v347_v15 = vpack.c.bf16 %v334_v57, %v333_v10  ;;  %v336_v16 = vmax.f32 %v320_v11, 0.0  ;;  %v323_v17 = vadd.f32 %v312_v0, %v303_v37  ;;  %p1015_p4 = pnand %p1014_p3, %p1008_p0 }
 0x131   :  { %949 = vmatprep.mubr.msk.bf16.mxu1 %vm185_vm1, %v345_v12  ;;  %v337_v18 = vmax.f32 %v321_v13, 0.0  ;;  %v338_v19 = vmax.f32 %v322_v62, 0.0  ;;  %v324_v20 = vadd.f32 %v312_v0, %v304_v30  ;;  %v325_v21 = vadd.f32 %v312_v0, %v305_v35 }
 0x132   :  { %950 = vmatmul.mubr.msk.bf16.vlgmr.msra.gmra.mrb[8].mxu1 %vm185_vm1, %v346_v14  ;;  %v348_v22 = vpack.c.bf16 %v336_v16, %v335_v53  ;;  %v339_v23 = vmax.f32 %v323_v17, 0.0  ;;  %v327_v24 = vadd.f32 %v312_v0, %v307_v55  ;;  %v328_v25 = vadd.f32 %v312_v0, %v308_v1 }
 0x133   :  { %953 = vmatprep.mubr.msk.bf16.mxu1 %vm185_vm1, %v347_v15  ;;  %v349_v26 = vpack.c.bf16 %v338_v19, %v337_v18  ;;  %v340_v27 = vmax.f32 %v324_v20, 0.0  ;;  %v341_v28 = vmax.f32 %v325_v21, 0.0 }
 0x134   :  { %v343_v29 = vmax.f32 %v327_v24, 0.0  ;;  %v344_v34 = vmax.f32 %v328_v25, 0.0 }
 0x135   :  { %v350_v41 = vpack.c.bf16 %v340_v27, %v339_v23  ;;  %v351_v42 = vpack.c.bf16 %v342_v38, %v341_v28 }
 0x136   :  { %v352_v43 = vpack.c.bf16 %v344_v34, %v343_v29 }
 0x13a   :  { %954 = vmatmul.mubr.msk.bf16.gmra.mrb[12].mxu1 %vm185_vm1, %v348_v22 }
 0x13b   :  { %957 = vmatprep.mubr.msk.bf16.mxu1 %vm185_vm1, %v349_v26 }
 0x142   :  { %958 = vmatmul.mubr.msk.bf16.gmra.mrb[16].mxu1 %vm185_vm1, %v350_v41 }
 0x143   :  { %961 = vmatprep.mubr.msk.bf16.mxu1 %vm185_vm1, %v351_v42 }
 0x14a   :  { %962 = vmatmul.mubr.msk.bf16.gmra.mrb[20].mxu1 %vm185_vm1, %v352_v43 }
 0x205   :  { %v1294_v47 = vpop.f32.mrb[8].mxu1 }
 0x206   :  { %v1296_v48 = vpop.f32.mrb[9].mxu1  ;;  %v546_v54 = vmul.f32 %v1294_v47, %v1294_v47  ;;  %v510_v63 = vsel %vm506_vm2, %v1294_v47, 0.0 }
 0x207   :  { %v544_v49 = vmul.f32 %v1296_v48, %v1296_v48  ;;  %v1300_v50 = vpop.f32.mrb[10].mxu1  ;;  %v507_v56 = vsel %vm506_vm2, %v1296_v48, 0.0 }
 0x208   :  { %v1302_v51 = vpop.f32.mrb[11].mxu1  ;;  %v547_v32 = vmul.f32 %v1300_v50, %v1300_v50  ;;  %v563_v0 = vsel %vm506_vm2, %v546_v54, 0.0  ;;  %v512_v55 = vsel %vm506_vm2, %v1300_v50, 0.0 }
 0x209   :  { %v508_v58 = vsel %vm506_vm2, %v1302_v51, 0.0  ;;  %v545_v59 = vmul.f32 %v1302_v51, %v1302_v51  ;;  %v560_v2 = vsel %vm506_vm2, %v544_v49, 0.0 }
 0x20a   :  { %v509_v60 = vadd.f32 %v508_v58, %v507_v56  ;;  %v565_v5 = vsel %vm506_vm2, %v547_v32, 0.0 }
 0x20b   :  { %v561_v37 = vsel %vm506_vm2, %v545_v59, 0.0 }
 0x20c   :  { %v511_v30 = vadd.f32 %v510_v63, %v509_v60  ;;  %v562_v35 = vadd.f32 %v561_v37, %v560_v2 }
 0x20d   :  { %v1321_v1 = vpop.f32.mrb[12].mxu1 }
 0x20e   :  { %v564_v3 = vadd.f32 %v563_v0, %v562_v35  ;;  %v1323_v4 = vpop.f32.mrb[13].mxu1  ;;  %v513_v52 = vadd.f32 %v512_v55, %v511_v30  ;;  %v550_v31 = vmul.f32 %v1321_v1, %v1321_v1  ;;  %v518_v12 = vsel %vm506_vm2, %v1321_v1, 0.0 }
 0x20f   :  { %v514_v61 = vsel %vm506_vm2, %v1323_v4, 0.0  ;;  %v548_v6 = vmul.f32 %v1323_v4, %v1323_v4  ;;  %v1330_v33 = vpop.f32.mrb[14].mxu1 }
 0x210   :  { %v515_v7 = vadd.f32 %v514_v61, %v513_v52  ;;  %v566_v38 = vadd.f32 %v565_v5, %v564_v3  ;;  %v1332_v8 = vpop.f32.mrb[15].mxu1  ;;  %v551_v53 = vmul.f32 %v1330_v33, %v1330_v33  ;;  %v571_v15 = vsel %vm506_vm2, %v550_v31, 0.0 }
 0x211   :  { %v567_v9 = vsel %vm506_vm2, %v548_v6, 0.0  ;;  %v516_v36 = vsel %vm506_vm2, %v1332_v8, 0.0  ;;  %v549_v10 = vmul.f32 %v1332_v8, %v1332_v8  ;;  %v520_v16 = vsel %vm506_vm2, %v1330_v33, 0.0 }
 0x212   :  { %v568_v57 = vadd.f32 %v567_v9, %v566_v38  ;;  %v517_v11 = vadd.f32 %v516_v36, %v515_v7  ;;  %v573_v21 = vsel %vm506_vm2, %v551_v53, 0.0 }
 0x213   :  { %v569_v13 = vsel %vm506_vm2, %v549_v10, 0.0 }
 0x214   :  { %v519_v62 = vadd.f32 %v518_v12, %v517_v11  ;;  %v570_v14 = vadd.f32 %v569_v13, %v568_v57 }
 0x215   :  { %v1349_v17 = vpop.f32.mrb[16].mxu1 }
 0x216   :  { %v572_v18 = vadd.f32 %v571_v15, %v570_v14  ;;  %v1351_v19 = vpop.f32.mrb[17].mxu1  ;;  %v521_v20 = vadd.f32 %v520_v16, %v519_v62  ;;  %v554_v28 = vmul.f32 %v1349_v17, %v1349_v17  ;;  %v526_v44 = vsel %vm506_vm2, %v1349_v17, 0.0 }
 0x217   :  { %v522_v22 = vsel %vm506_vm2, %v1351_v19, 0.0  ;;  %v552_v23 = vmul.f32 %v1351_v19, %v1351_v19  ;;  %v1358_v24 = vpop.f32.mrb[18].mxu1 }
 0x218   :  { %v523_v25 = vadd.f32 %v522_v22, %v521_v20  ;;  %v574_v26 = vadd.f32 %v573_v21, %v572_v18  ;;  %v1360_v27 = vpop.f32.mrb[19].mxu1  ;;  %v555_v45 = vmul.f32 %v1358_v24, %v1358_v24  ;;  %v579_v56 = vsel %vm506_vm2, %v554_v28, 0.0 }
 0x219   :  { %v575_v29 = vsel %vm506_vm2, %v552_v23, 0.0  ;;  %v524_v34 = vsel %vm506_vm2, %v1360_v27, 0.0  ;;  %v553_v41 = vmul.f32 %v1360_v27, %v1360_v27  ;;  %v528_v58 = vsel %vm506_vm2, %v1358_v24, 0.0 }
 0x21a   :  { %v576_v42 = vadd.f32 %v575_v29, %v574_v26  ;;  %v525_v43 = vadd.f32 %v524_v34, %v523_v25  ;;  %v581_v32 = vsel %vm506_vm2, %v555_v45, 0.0 }
 0x21b   :  { %v577_v46 = vsel %vm506_vm2, %v553_v41, 0.0 }
 0x21c   :  { %v527_v49 = vadd.f32 %v526_v44, %v525_v43  ;;  %v578_v54 = vadd.f32 %v577_v46, %v576_v42 }
 0x21d   :  { %v1377_v59 = vpop.f32.mrb[20].mxu1 }
 0x21e   :  { %v580_v60 = vadd.f32 %v579_v56, %v578_v54  ;;  %v491_v63 = vpop.f32.mrb[21].mxu1  ;;  %v529_v2 = vadd.f32 %v528_v58, %v527_v49  ;;  %v558_v52 = vmul.f32 %v1377_v59, %v1377_v59  ;;  %v534_v31 = vsel %vm506_vm2, %v1377_v59, 0.0 }
 0x21f   :  { %v530_v37 = vsel %vm506_vm2, %v491_v63, 0.0  ;;  %v556_v30 = vmul.f32 %v491_v63, %v491_v63  ;;  %v1381_v35 = vpop.f32.mrb[22].mxu1  ;;  %v612_v49 = vsub.s32 2, %v1250_v39 }
 0x220   :  { %v531_v0 = vadd.f32 %v530_v37, %v529_v2  ;;  %v582_v55 = vadd.f32 %v581_v32, %v580_v60  ;;  %v494_v3 = vpop.f32.mrb[23].mxu1  ;;  %v559_v9 = vmul.f32 %v1381_v35, %v1381_v35  ;;  %v587_v11 = vsel %vm506_vm2, %v558_v52, 0.0 }
 0x221   :  { %v583_v5 = vsel %vm506_vm2, %v556_v30, 0.0  ;;  %v532_v61 = vsel %vm506_vm2, %v494_v3, 0.0  ;;  %v557_v6 = vmul.f32 %v494_v3, %v494_v3  ;;  %v536_v12 = vsel %vm506_vm2, %v1381_v35, 0.0 }
 0x222   :  { %v584_v7 = vadd.f32 %v583_v5, %v582_v55  ;;  %v533_v38 = vadd.f32 %v532_v61, %v531_v0  ;;  %v589_v62 = vsel %vm506_vm2, %v559_v9, 0.0  ;;  %v632_v2 = vsub.s32 3, %v1250_v39 }
 0x223   :  { %v585_v36 = vsel %vm506_vm2, %v557_v6, 0.0 }
 0x224   :  { %v535_v10 = vadd.f32 %v534_v31, %v533_v38  ;;  %v586_v57 = vadd.f32 %v585_v36, %v584_v7 }
 0x226   :  { %v537_v53 = vadd.f32 %v536_v12, %v535_v10  ;;  %v588_v13 = vadd.f32 %v587_v11, %v586_v57 }
 0x228   :  { %v538_v14 = vrot.slane %v537_v53, 4  ;;  %v590_v15 = vadd.f32 %v589_v62, %v588_v13 }
 0x22a   :  { %v539_v16 = vadd.f32 %v538_v14, %v537_v53  ;;  %v591_v18 = vrot.slane %v590_v15, 4 }
 0x22c   :  { %v540_v20 = vrot.slane %v539_v16, 2  ;;  %v592_v21 = vadd.f32 %v591_v18, %v590_v15 }
 0x22e   :  { %v541_v22 = vadd.f32 %v540_v20, %v539_v16  ;;  %v593_v23 = vrot.slane %v592_v21, 2 }
 0x230   :  { %v542_v25 = vrot.slane %v541_v22, 1  ;;  %v594_v26 = vadd.f32 %v593_v23, %v592_v21 }
 0x232   :  { %v543_v28 = vadd.f32 %v542_v25, %v541_v22  ;;  %v595_v29 = vrot.slane %v594_v26, 1 }
 0x234   :  { %v596_v34 = vadd.f32 %v595_v29, %v594_v26  ;;  %v597_v41 = vmul.f32 0.0078125, %v543_v28 }
 0x236   :  { %v598_v42 = vmul.f32 0.0078125, %v596_v34  ;;  %v599_v43 = vmul.f32 %v597_v41, %v597_v41 }
 0x238   :  { %v600_v44 = vsub.f32 %v598_v42, %v599_v43 }
 0x23a   :  { %v601_v45 = vmax.f32 %v600_v44, 0.0 }
 0x23c   :  { %v602_v46 = vadd.f32 1e-05, %v601_v45 }
 0x23e   :  { %1005 = vrsqrt.f32 %v602_v46 }
 0x248   :  { %v1006_v54 = vpop.eup %1005 }
 0x249   :  { %v604_v56 = vmul.f32 %v1006_v54, %v1255_v40 }
 0x24b   :  { %v605_v58 = vmul.f32 %v604_v56, %v597_v41  ;;  %v613_v60 = vrot.slane %v604_v56, %v612_v49 }
 0x24d   :  { %v607_v32 = vrot.slane %v605_v58, 7  ;;  %v626_v37 = vmul.f32 %v613_v60, %v491_v63  ;;  %v627_v30 = vmul.f32 %v613_v60, %v494_v3  ;;  %v614_v0 = vmul.f32 %v613_v60, %v1296_v48 }
 0x24e   :  { %v615_v55 = vmul.f32 %v613_v60, %v1302_v51  ;;  %v616_v52 = vmul.f32 %v1294_v47, %v613_v60  ;;  %v617_v5 = vmul.f32 %v1300_v50, %v613_v60  ;;  %v618_v61 = vmul.f32 %v613_v60, %v1323_v4 }
 0x24f   :  { %v609_v6 = vsub.f32 %v1255_v40, %v607_v32  ;;  %v619_v7 = vmul.f32 %v613_v60, %v1332_v8  ;;  %v620_v38 = vmul.f32 %v1321_v1, %v613_v60  ;;  %v621_v31 = vmul.f32 %v1330_v33, %v613_v60 }
 0x250   :  { %v622_v63 = vmul.f32 %v613_v60, %v1351_v19  ;;  %v623_v48 = vmul.f32 %v613_v60, %v1360_v27  ;;  %v624_v51 = vmul.f32 %v1349_v17, %v613_v60  ;;  %v625_v47 = vmul.f32 %v1358_v24, %v613_v60 }
 0x251   :  { %v633_v3 = vrot.slane %v609_v6, %v632_v2  ;;  %v628_v50 = vmul.f32 %v1377_v59, %v613_v60  ;;  %v629_v4 = vmul.f32 %v1381_v35, %v613_v60  ;;  %v682_v58 = vsub.s32 4, %v1250_v39 }
 0x253   :  { %v646_v9 = vadd.f32 %v633_v3, %v626_v37  ;;  %v647_v36 = vadd.f32 %v633_v3, %v627_v30  ;;  %v634_v8 = vadd.f32 %v633_v3, %v614_v0  ;;  %v635_v10 = vadd.f32 %v633_v3, %v615_v55 }
 0x254   :  { %v636_v1 = vadd.f32 %v633_v3, %v616_v52  ;;  %v637_v57 = vadd.f32 %v633_v3, %v617_v5  ;;  %v638_v33 = vadd.f32 %v633_v3, %v618_v61  ;;  %v639_v11 = vadd.f32 %v633_v3, %v619_v7 }
 0x255   :  { %v662_v19 = vmax.f32 %v646_v9, 0.0  ;;  %v663_v12 = vmax.f32 %v647_v36, 0.0  ;;  %v650_v27 = vmax.f32 %v634_v8, 0.0  ;;  %v651_v53 = vmax.f32 %v635_v10, 0.0 }
 0x256   :  { %v652_v17 = vmax.f32 %v636_v1, 0.0  ;;  %v653_v13 = vmax.f32 %v637_v57, 0.0  ;;  %v654_v24 = vmax.f32 %v638_v33, 0.0  ;;  %v655_v62 = vmax.f32 %v639_v11, 0.0 }
 0x257   :  { %v672_v14 = vpack.c.bf16 %v663_v12, %v662_v19  ;;  %v666_v59 = vpack.c.bf16 %v651_v53, %v650_v27  ;;  %v640_v15 = vadd.f32 %v633_v3, %v620_v38  ;;  %v641_v35 = vadd.f32 %v633_v3, %v621_v31 }
 0x258   :  { %v667_v16 = vpack.c.bf16 %v653_v13, %v652_v17  ;;  %v668_v18 = vpack.c.bf16 %v655_v62, %v654_v24  ;;  %v642_v20 = vadd.f32 %v633_v3, %v622_v63  ;;  %v643_v21 = vadd.f32 %v633_v3, %v623_v48 }
 0x259   :  { %971 = vmatprep.mubr.msk.bf16.mxu0 %vm506_vm2, %v666_v59  ;;  %v656_v22 = vmax.f32 %v640_v15, 0.0  ;;  %v657_v23 = vmax.f32 %v641_v35, 0.0  ;;  %v644_v25 = vadd.f32 %v633_v3, %v624_v51  ;;  %v645_v26 = vadd.f32 %v633_v3, %v625_v47 }
 0x25a   :  { %972 = vmatmul.mubr.msk.bf16.vlgmr.msra.gmra.mrb[8].mxu0 %vm506_vm2, %v667_v16  ;;  %v658_v28 = vmax.f32 %v642_v20, 0.0  ;;  %v659_v29 = vmax.f32 %v643_v21, 0.0  ;;  %v648_v34 = vadd.f32 %v633_v3, %v628_v50  ;;  %v649_v41 = vadd.f32 %v633_v3, %v629_v4 }
 0x25b   :  { %975 = vmatprep.mubr.msk.bf16.mxu0 %vm506_vm2, %v668_v18  ;;  %v669_v42 = vpack.c.bf16 %v657_v23, %v656_v22  ;;  %v660_v43 = vmax.f32 %v644_v25, 0.0  ;;  %v661_v44 = vmax.f32 %v645_v26, 0.0  ;;  %v683_v60 = vrot.slane %v1255_v40, %v682_v58 }
 0x25c   :  { %v670_v45 = vpack.c.bf16 %v659_v29, %v658_v28  ;;  %v664_v46 = vmax.f32 %v648_v34, 0.0  ;;  %v665_v49 = vmax.f32 %v649_v41, 0.0 }
 0x25d   :  { %v671_v54 = vpack.c.bf16 %v661_v44, %v660_v43 }
 0x25e   :  { %v673_v56 = vpack.c.bf16 %v665_v49, %v664_v46 }
 0x262   :  { %976 = vmatmul.mubr.msk.bf16.gmra.mrb[12].mxu0 %vm506_vm2, %v669_v42 }
 0x263   :  { %979 = vmatprep.mubr.msk.bf16.mxu0 %vm506_vm2, %v670_v45 }
 0x26a   :  { %980 = vmatmul.mubr.msk.bf16.gmra.mrb[16].mxu0 %vm506_vm2, %v671_v54 }
 0x26b   :  { %983 = vmatprep.mubr.msk.bf16.mxu0 %vm506_vm2, %v672_v14 }
 0x272   :  { %984 = vmatmul.mubr.msk.bf16.gmra.mrb[20].mxu0 %vm506_vm2, %v673_v56 }
 0x32d   :  { %v973_v2 = vpop.f32.mrb[8].mxu0 }
 0x32e   :  { %v769_v32 = vadd.f32 %v973_v2, %v683_v60  ;;  %v760_v37 = vpop.f32.mrb[9].mxu0 }
 0x32f   :  { %v761_v30 = vadd.f32 %v760_v37, %v683_v60  ;;  %v974_v0 = vpop.f32.mrb[10].mxu0 }
 0x330   :  { %825 = vst [vmem:[#allocation2 + $0x10] sm:$0xff] %v769_v32  ;;  %v772_v55 = vadd.f32 %v974_v0, %v683_v60  ;;  %v763_v52 = vpop.f32.mrb[11].mxu0 }
 0x331   :  { %823 = vst [vmem:[#allocation2] sm:$0xff] %v761_v30  ;;  %v764_v5 = vadd.f32 %v763_v52, %v683_v60 }
 0x332   :  { %826 = vst [vmem:[#allocation2 + $0x18] sm:$0xff] %v772_v55 }
 0x333   :  { %824 = vst [vmem:[#allocation2 + $0x8] sm:$0xff] %v764_v5 }
 0x335   :  { %v977_v61 = vpop.f32.mrb[12].mxu0 }
 0x336   :  { %v785_v6 = vadd.f32 %v977_v61, %v683_v60  ;;  %v776_v7 = vpop.f32.mrb[13].mxu0 }
 0x337   :  { %v777_v38 = vadd.f32 %v776_v7, %v683_v60  ;;  %v978_v31 = vpop.f32.mrb[14].mxu0 }
 0x338   :  { %829 = vst [vmem:[#allocation2 + $0x30] sm:$0xff] %v785_v6  ;;  %v788_v39 = vadd.f32 %v978_v31, %v683_v60  ;;  %v779_v40 = vpop.f32.mrb[15].mxu0 }
 0x339   :  { %827 = vst [vmem:[#allocation2 + $0x20] sm:$0xff] %v777_v38  ;;  %v780_v63 = vadd.f32 %v779_v40, %v683_v60 }
 0x33a   :  { %830 = vst [vmem:[#allocation2 + $0x38] sm:$0xff] %v788_v39 }
 0x33b   :  { %828 = vst [vmem:[#allocation2 + $0x28] sm:$0xff] %v780_v63 }
 0x33d   :  { %v981_v48 = vpop.f32.mrb[16].mxu0 }
 0x33e   :  { %v801_v51 = vadd.f32 %v981_v48, %v683_v60  ;;  %v792_v47 = vpop.f32.mrb[17].mxu0 }
 0x33f   :  { %v793_v3 = vadd.f32 %v792_v47, %v683_v60  ;;  %v982_v50 = vpop.f32.mrb[18].mxu0 }
 0x340   :  { %833 = vst [vmem:[#allocation2 + $0x50] sm:$0xff] %v801_v51  ;;  %v804_v4 = vadd.f32 %v982_v50, %v683_v60  ;;  %v795_v9 = vpop.f32.mrb[19].mxu0 }
 0x341   :  { %831 = vst [vmem:[#allocation2 + $0x40] sm:$0xff] %v793_v3  ;;  %v796_v36 = vadd.f32 %v795_v9, %v683_v60 }
 0x342   :  { %834 = vst [vmem:[#allocation2 + $0x58] sm:$0xff] %v804_v4 }
 0x343   :  { %832 = vst [vmem:[#allocation2 + $0x48] sm:$0xff] %v796_v36 }
 0x345   :  { %v985_v8 = vpop.f32.mrb[20].mxu0 }
 0x346   :  { %v817_v10 = vadd.f32 %v985_v8, %v683_v60  ;;  %v808_v1 = vpop.f32.mrb[21].mxu0 }
 0x347   :  { %v809_v57 = vadd.f32 %v808_v1, %v683_v60  ;;  %v986_v33 = vpop.f32.mrb[22].mxu0 }
 0x348   :  { %837 = vst [vmem:[#allocation2 + $0x70] sm:$0xff] %v817_v10  ;;  %v820_v11 = vadd.f32 %v986_v33, %v683_v60  ;;  %v811_v19 = vpop.f32.mrb[23].mxu0 }
 0x349   :  { %835 = vst [vmem:[#allocation2 + $0x60] sm:$0xff] %v809_v57  ;;  %v812_v12 = vadd.f32 %v811_v19, %v683_v60 }
 0x34a   :  { %838 = vst [vmem:[#allocation2 + $0x78] sm:$0xff] %v820_v11 }
 0x34b   :  { %836 = vst [vmem:[#allocation2 + $0x68] sm:$0xff] %v812_v12 }
 0x34c   :  { %1018 = shalt.err (!%p1015_p4)
}
 0x34d   :  { %s1019_s19 = scalar_lea.hbm %s1441_s5, 2048 }
 0x34e   :  { %p1020_p5 = scmp.ne.s32.totalorder %s1441_s5, %s1019_s19  ;;  %p1023_p6 = scmp.lt.u32.totalorder %s1019_s19, %s1441_s5 }
 0x350   :  { %p1025_p7 = pnand %p1023_p6, %p1020_p5 }
 0x352   :  { %1028 = shalt.err (!%p1025_p7)
}
 0x353   :  { %s1032_s24 = smov 128   ;;  %s1033_s25 = smov 8  }
 0x354   :  { %850 = dma.vmem_to_hbm [thread:$0]  %s845_s15, 2048, %s1441_s5, [#allocation3], %s1032_s24, %s1032_s24, %s1033_s25  }
 0x355   :  { %1029 = dma.done.wait [#allocation3], 2048  }
 0x356   :  { %1030 = vsyncadd [#allocation3], 4294965248 }
 0x357   :  { %854 = vsyncpa [#allocation3], 1 }

</bundles_post_ra>
